<compile_context>
chip_gen: v5e
topology: v5e:2x2
jax: 0.10.0
libtpu: 0.0.40
codegen_flags: <defaults>
</compile_context>

<pallas_src>
import jax
import jax.numpy as jnp
from jax.experimental import pallas as pl
from jax.experimental.pallas import tpu as pltpu

_LANES = 128                  # slab lane width (multiple of 4 and of 128)
_ANCHORS_PER_ROW = _LANES // 4
_BLOCK_ROWS = 4096            # max sublane rows per block -> 2 MiB f32 blocks
_SINGLE_BLOCK_ROWS = 256      # below this, one block (overhead-dominated)
_MIN_STEPS = 4                # >= 4 grid steps once we tile at all


def _make_bbox_kernel(mean, std):
    m0, m1, m2, m3 = (float(v) for v in mean)
    s0, s1, s2, s3 = (float(v) for v in std)
    has_mean = any(m != 0.0 for m in (m0, m1, m2, m3))

    def kernel(b_ref, d_ref, o_ref):
        b = b_ref[...]          # (TM, 128) f32, interleaved x1,y1,x2,y2,...
        d = d_ref[...]
        shape = b.shape
        lanes = shape[1]

        # ---- per-lane metadata: built on a single (1, 128) vreg per grid
        # step (negligible), then hoisted to full tile width exactly once and
        # reused everywhere (JAX does not CSE broadcast_in_dim). ----
        lane = jax.lax.broadcasted_iota(jnp.int32, (1, lanes), 1)
        coord = lane & 3                      # 0:x1  1:y1  2:x2  3:y2
        is_lo = coord < 2                     # x1/y1 lanes vs x2/y2 lanes
        group = lane >> 2                     # anchor id within the row
        # Partner lane = lane ^ 2 (x1<->x2, y1<->y2 inside each 4-lane group).
        # Keep whichever roll direction stayed inside the same anchor group,
        # so the code is independent of the roll sign convention and
        # wrap-around lanes are never selected.
        same_grp = pltpu.roll(group, 2, axis=1) == group

        std_lane = jnp.where(coord == 0, s0,
                   jnp.where(coord == 1, s1,
                   jnp.where(coord == 2, s2, s3))).astype(jnp.float32)

        is_lo_f = jnp.broadcast_to(is_lo, shape)
        same_f = jnp.broadcast_to(same_grp, shape)
        sign_f = jnp.broadcast_to(
            jnp.where(is_lo, jnp.float32(-1.0), jnp.float32(1.0)), shape)
        half_f = jnp.broadcast_to(
            jnp.where(is_lo, jnp.float32(-0.5), jnp.float32(0.5)), shape)
        std_f = jnp.broadcast_to(std_lane, shape)

        dd = d * std_f
        if has_mean:
            mean_lane = jnp.where(coord == 0, m0,
                        jnp.where(coord == 1, m1,
                        jnp.where(coord == 2, m2, m3))).astype(jnp.float32)
            dd = dd + jnp.broadcast_to(mean_lane, shape)

        def partner(x):
            return jnp.where(same_f,
                             pltpu.roll(x, 2, axis=1),
                             pltpu.roll(x, lanes - 2, axis=1))

        b_p = partner(b)        # x2 on x1 lanes, x1 on x2 lanes, ...
        d_p = partner(dd)       # dw on dx lanes, dx on dw lanes, ...

        size = (b - b_p) * sign_f            # widths on x lanes, heights on y
        ctr = 0.5 * (b + b_p)                # center_x / center_y on every lane
        d_shift = jnp.where(is_lo_f, dd, d_p)   # dx / dy (scaled)
        d_size = jnp.where(is_lo_f, d_p, dd)    # dw / dh (scaled)

        # lo lanes: ctr + w*(dx - 0.5*exp(dw))   (pred x1 / y1)
        # hi lanes: ctr + w*(dx + 0.5*exp(dw))   (pred x2 / y2)
        pred = ctr + size * (d_shift + half_f * jnp.exp(d_size))
        o_ref[...] = pred.astype(o_ref.dtype)

    return kernel


def _choose_tile(rows, block_rows):
    """Pick the sublane tile size `tm` and grid step count for a (rows, 128) slab.

    - rows <= _SINGLE_BLOCK_ROWS: one full block (tiny input; step overhead
      would dominate anyway).
    - otherwise: tm is a multiple of 8, capped by block_rows and by rows//4 so
      the grid has >= 4 steps (double buffering + both v7x TensorCores).
      Prefer a tm that divides rows exactly (all blocks full -> unmasked
      stores) with an even step count; fall back to a ragged last block
      (Pallas masks out-of-bounds stores) only if no nearby divisor exists.
    """
    if rows <= _SINGLE_BLOCK_ROWS:
        return rows, 1
    target = min(block_rows, rows // _MIN_STEPS)
    target = max(8, (target // 8) * 8)
    floor = max(8, (target // 2 // 8) * 8)
    odd_grid_fallback = None
    for tm in range(target, floor - 1, -8):
        if rows % tm == 0:
            if (rows // tm) % 2 == 0:
                return tm, rows // tm          # exact divisor, even step count
            if odd_grid_fallback is None:
                odd_grid_fallback = tm
    if odd_grid_fallback is not None:
        return odd_grid_fallback, rows // odd_grid_fallback
    return target, pl.cdiv(rows, target)       # ragged last block (masked)


def _decode_xla(boxes2d, deltas2d, mean, std):
    """Plain-XLA decode for a small (T, 4) tail of anchors."""
    w = boxes2d[:, 2] - boxes2d[:, 0]
    h = boxes2d[:, 3] - boxes2d[:, 1]
    cx = boxes2d[:, 0] + 0.5 * w
    cy = boxes2d[:, 1] + 0.5 * h
    dx = deltas2d[:, 0] * std[0] + mean[0]
    dy = deltas2d[:, 1] * std[1] + mean[1]
    dw = deltas2d[:, 2] * std[2] + mean[2]
    dh = deltas2d[:, 3] * std[3] + mean[3]
    pcx = cx + dx * w
    pcy = cy + dy * h
    pw = jnp.exp(dw) * w
    ph = jnp.exp(dh) * h
    return jnp.stack(
        [pcx - 0.5 * pw, pcy - 0.5 * ph, pcx + 0.5 * pw, pcy + 0.5 * ph],
        axis=1)


def bbox_transform(boxes, deltas, mean=None, std=None, *, block_rows=_BLOCK_ROWS):
    """boxes, deltas: (B, N, 4) -> decoded boxes (B, N, 4) float32."""
    mean = (0.0, 0.0, 0.0, 0.0) if mean is None else tuple(float(v) for v in mean)
    std = (0.1, 0.1, 0.2, 0.2) if std is None else tuple(float(v) for v in std)

    B, N, C = boxes.shape
    assert C == 4 and deltas.shape == boxes.shape
    boxes = boxes.astype(jnp.float32)
    deltas = deltas.astype(jnp.float32)

    total_anchors = B * N
    main_anchors = (total_anchors // _ANCHORS_PER_ROW) * _ANCHORS_PER_ROW
    tail_anchors = total_anchors - main_anchors

    flat_b = boxes.reshape(-1)     # free reshape, keeps interleaved layout
    flat_d = deltas.reshape(-1)

    pieces = []

    if main_anchors:
        rows = (main_anchors * 4) // _LANES
        if tail_anchors:
            # Misaligned path: the prefix slice costs one copy of each input;
            # the aligned path (B*N % 32 == 0) is fully zero-copy.
            mb = flat_b[: main_anchors * 4]
            md = flat_d[: main_anchors * 4]
        else:
            mb, md = flat_b, flat_d
        b2 = mb.reshape(rows, _LANES)
        d2 = md.reshape(rows, _LANES)

        tm, grid_steps = _choose_tile(rows, block_rows)

        block_bytes = tm * _LANES * 4
        # 3 operands x 2 buffers, plus headroom for compiler scratch; capped
        # well below v7x's 64 MiB physical VMEM.
        vmem_limit = int(min(48 << 20, max(8 << 20, 6 * block_bytes + (4 << 20))))

        elems = rows * _LANES
        cost = pl.CostEstimate(flops=15 * elems,
                               transcendentals=elems,
                               bytes_accessed=3 * elems * 4)

        out_main = pl.pallas_call(
            _make_bbox_kernel(mean, std),
            out_shape=jax.ShapeDtypeStruct((rows, _LANES), jnp.float32),
            grid=(grid_steps,),
            in_specs=[
                pl.BlockSpec((tm, _LANES), lambda i: (i, 0)),
                pl.BlockSpec((tm, _LANES), lambda i: (i, 0)),
            ],
            out_specs=pl.BlockSpec((tm, _LANES), lambda i: (i, 0)),
            compiler_params=pltpu.CompilerParams(
                dimension_semantics=("parallel",),
                vmem_limit_bytes=vmem_limit),
            cost_estimate=cost,
        )(b2, d2)
        pieces.append(out_main.reshape(-1))

    if tail_anchors:
        tb = flat_b[main_anchors * 4:].reshape(tail_anchors, 4)
        td = flat_d[main_anchors * 4:].reshape(tail_anchors, 4)
        pieces.append(_decode_xla(tb, td, mean, std).reshape(-1))

    out = pieces[0] if len(pieces) == 1 else jnp.concatenate(pieces)
    return out.reshape(B, N, 4)


def _reference(boxes, deltas, mean, std):
    widths = boxes[:, :, 2] - boxes[:, :, 0]
    heights = boxes[:, :, 3] - boxes[:, :, 1]
    ctr_x = boxes[:, :, 0] + 0.5 * widths
    ctr_y = boxes[:, :, 1] + 0.5 * heights
    dx = deltas[:, :, 0] * std[0] + mean[0]
    dy = deltas[:, :, 1] * std[1] + mean[1]
    dw = deltas[:, :, 2] * std[2] + mean[2]
    dh = deltas[:, :, 3] * std[3] + mean[3]
    pred_ctr_x = ctr_x + dx * widths
    pred_ctr_y = ctr_y + dy * heights
    pred_w = jnp.exp(dw) * widths
    pred_h = jnp.exp(dh) * heights
    return jnp.stack(
        [
            pred_ctr_x - 0.5 * pred_w,
            pred_ctr_y - 0.5 * pred_h,
            pred_ctr_x + 0.5 * pred_w,
            pred_ctr_y + 0.5 * pred_h,
        ],
        axis=2,
    )


if __name__ == "__main__":
    key = jax.random.PRNGKey(0)
    mean = jnp.array([0.0, 0.0, 0.0, 0.0], dtype=jnp.float32)
    std = jnp.array([0.1, 0.1, 0.2, 0.2], dtype=jnp.float32)

    def make_inputs(k, B, N):
        k1, k2, k3 = jax.random.split(k, 3)
        # valid-ish anchor boxes: (x1, y1, x2, y2) with x2 > x1, y2 > y1
        xy = jax.random.uniform(k1, (B, N, 2), dtype=jnp.float32) * 100.0
        wh = jax.random.uniform(k2, (B, N, 2), dtype=jnp.float32) * 50.0 + 1.0
        boxes = jnp.concatenate([xy, xy + wh], axis=2)                 # (B, N, 4)
        deltas = jax.random.normal(k3, (B, N, 4), dtype=jnp.float32)   # (B, N, 4)
        return boxes, deltas

    cases = [
        (2, 512),    # aligned, single-block path (rows = 32)
        (2, 8192),   # aligned, tiled path (rows = 512 -> tm=128, grid=4)
        (1, 37),     # misaligned: kernel on 32-anchor prefix + XLA tail
    ]
    for (B, N) in cases:
        key, sub = jax.random.split(key)
        boxes, deltas = make_inputs(sub, B, N)
        pred = jax.block_until_ready(bbox_transform(boxes, deltas))
        ref = _reference(boxes, deltas, mean, std)
        assert pred.shape == (B, N, 4)
        err = float(jnp.max(jnp.abs(pred - ref)))
        assert jnp.allclose(pred, ref, atol=1e-4, rtol=1e-4), ((B, N), err)

    print("KERNEL_OK")
</pallas_src>

<mosaic_0001>
module attributes {stable_mosaic.version = 11 : i64} {
  func.func @kernel(%arg0: i32, %arg1: memref<32x128xf32, #tpu.memory_space<vmem>>, %arg2: memref<32x128xf32, #tpu.memory_space<vmem>>, %arg3: memref<32x128xf32, #tpu.memory_space<vmem>>) attributes {dimension_semantics = [#tpu.dimension_semantics<parallel>], iteration_bounds = array<i64: 1>, scalar_prefetch = 0 : i64, scratch_operands = 0 : i64, tpu.core_type = #tpu.core_type<tc>, window_params = [{transform_indices = @transform_0, window_bounds = array<i64: 32, 128>}, {transform_indices = @transform_1, window_bounds = array<i64: 32, 128>}, {transform_indices = @transform_2, window_bounds = array<i64: 32, 128>}]} {
    %c0 = arith.constant 0 : index
    %c0_0 = arith.constant 0 : index
    %0 = vector.load %arg1[%c0, %c0_0] : memref<32x128xf32, #tpu.memory_space<vmem>>, vector<32x128xf32>
    %c0_1 = arith.constant 0 : index
    %c0_2 = arith.constant 0 : index
    %1 = vector.load %arg2[%c0_1, %c0_2] : memref<32x128xf32, #tpu.memory_space<vmem>>, vector<32x128xf32>
    %2 = tpu.iota {dimensions = array<i32: 1>} : vector<1x128xi32>
    %c3_i32 = arith.constant 3 : i32
    %3 = vector.broadcast %c3_i32 : i32 to vector<1x128xi32>
    %4 = arith.andi %2, %3 : vector<1x128xi32>
    %c2_i32 = arith.constant 2 : i32
    %5 = vector.broadcast %c2_i32 : i32 to vector<1x128xi32>
    %6 = arith.cmpi slt, %4, %5 : vector<1x128xi32>
    %c2_i32_3 = arith.constant 2 : i32
    %7 = vector.broadcast %c2_i32_3 : i32 to vector<1x128xi32>
    %8 = arith.shrsi %2, %7 : vector<1x128xi32>
    %c2_i32_4 = arith.constant 2 : i32
    %9 = tpu.dynamic_rotate %8 by %c2_i32_4 dim 1 : vector<1x128xi32>, i32 -> vector<1x128xi32>
    %10 = arith.cmpi eq, %9, %8 : vector<1x128xi32>
    %c0_i32 = arith.constant 0 : i32
    %11 = vector.broadcast %c0_i32 : i32 to vector<1x128xi32>
    %12 = arith.cmpi eq, %4, %11 : vector<1x128xi32>
    %c1_i32 = arith.constant 1 : i32
    %13 = vector.broadcast %c1_i32 : i32 to vector<1x128xi32>
    %14 = arith.cmpi eq, %4, %13 : vector<1x128xi32>
    %c2_i32_5 = arith.constant 2 : i32
    %15 = vector.broadcast %c2_i32_5 : i32 to vector<1x128xi32>
    %16 = arith.cmpi eq, %4, %15 : vector<1x128xi32>
    %cst = arith.constant 2.000000e-01 : f32
    %cst_6 = arith.constant 2.000000e-01 : f32
    %17 = vector.broadcast %cst : f32 to vector<1x128xf32>
    %18 = vector.broadcast %cst_6 : f32 to vector<1x128xf32>
    %19 = arith.select %16, %17, %18 : vector<1x128xi1>, vector<1x128xf32>
    %cst_7 = arith.constant 1.000000e-01 : f32
    %20 = vector.broadcast %cst_7 : f32 to vector<1x128xf32>
    %21 = arith.select %14, %20, %19 : vector<1x128xi1>, vector<1x128xf32>
    %cst_8 = arith.constant 1.000000e-01 : f32
    %22 = vector.broadcast %cst_8 : f32 to vector<1x128xf32>
    %23 = arith.select %12, %22, %21 : vector<1x128xi1>, vector<1x128xf32>
    %24 = vector.shape_cast %6 : vector<1x128xi1> to vector<1x128xi1>
    %25 = vector.broadcast %24 : vector<1x128xi1> to vector<32x128xi1>
    %26 = vector.shape_cast %10 : vector<1x128xi1> to vector<1x128xi1>
    %27 = vector.broadcast %26 : vector<1x128xi1> to vector<32x128xi1>
    %cst_9 = arith.constant -1.000000e+00 : f32
    %cst_10 = arith.constant 1.000000e+00 : f32
    %28 = vector.broadcast %cst_9 : f32 to vector<1x128xf32>
    %29 = vector.broadcast %cst_10 : f32 to vector<1x128xf32>
    %30 = arith.select %6, %28, %29 : vector<1x128xi1>, vector<1x128xf32>
    %31 = vector.shape_cast %30 : vector<1x128xf32> to vector<1x128xf32>
    %32 = vector.broadcast %31 : vector<1x128xf32> to vector<32x128xf32>
    %cst_11 = arith.constant -5.000000e-01 : f32
    %cst_12 = arith.constant 5.000000e-01 : f32
    %33 = vector.broadcast %cst_11 : f32 to vector<1x128xf32>
    %34 = vector.broadcast %cst_12 : f32 to vector<1x128xf32>
    %35 = arith.select %6, %33, %34 : vector<1x128xi1>, vector<1x128xf32>
    %36 = vector.shape_cast %35 : vector<1x128xf32> to vector<1x128xf32>
    %37 = vector.broadcast %36 : vector<1x128xf32> to vector<32x128xf32>
    %38 = vector.shape_cast %23 : vector<1x128xf32> to vector<1x128xf32>
    %39 = vector.broadcast %38 : vector<1x128xf32> to vector<32x128xf32>
    %40 = arith.mulf %1, %39 : vector<32x128xf32>
    %c2_i32_13 = arith.constant 2 : i32
    %41 = tpu.dynamic_rotate %0 by %c2_i32_13 dim 1 : vector<32x128xf32>, i32 -> vector<32x128xf32>
    %c126_i32 = arith.constant 126 : i32
    %42 = tpu.dynamic_rotate %0 by %c126_i32 dim 1 : vector<32x128xf32>, i32 -> vector<32x128xf32>
    %43 = arith.select %27, %41, %42 : vector<32x128xi1>, vector<32x128xf32>
    %c2_i32_14 = arith.constant 2 : i32
    %44 = tpu.dynamic_rotate %40 by %c2_i32_14 dim 1 : vector<32x128xf32>, i32 -> vector<32x128xf32>
    %c126_i32_15 = arith.constant 126 : i32
    %45 = tpu.dynamic_rotate %40 by %c126_i32_15 dim 1 : vector<32x128xf32>, i32 -> vector<32x128xf32>
    %46 = arith.select %27, %44, %45 : vector<32x128xi1>, vector<32x128xf32>
    %47 = arith.subf %0, %43 : vector<32x128xf32>
    %48 = arith.mulf %47, %32 : vector<32x128xf32>
    %49 = arith.addf %0, %43 : vector<32x128xf32>
    %cst_16 = arith.constant 5.000000e-01 : f32
    %50 = vector.broadcast %cst_16 : f32 to vector<32x128xf32>
    %51 = arith.mulf %50, %49 : vector<32x128xf32>
    %52 = arith.select %25, %40, %46 : vector<32x128xi1>, vector<32x128xf32>
    %53 = arith.select %25, %46, %40 : vector<32x128xi1>, vector<32x128xf32>
    %54 = math.exp %53 : vector<32x128xf32>
    %55 = arith.mulf %37, %54 : vector<32x128xf32>
    %56 = arith.addf %52, %55 : vector<32x128xf32>
    %57 = arith.mulf %48, %56 : vector<32x128xf32>
    %58 = arith.addf %51, %57 : vector<32x128xf32>
    %c0_17 = arith.constant 0 : index
    %c0_18 = arith.constant 0 : index
    %59 = vector.load %arg3[%c0_17, %c0_18] : memref<32x128xf32, #tpu.memory_space<vmem>>, vector<32x128xf32>
    tpu.vector_store %arg3[%c0_17, %c0_18], %58 {strides = array<i32>} : memref<32x128xf32, #tpu.memory_space<vmem>>, vector<32x128xf32>,
    return
  }
  func.func @transform_0(%arg0: i32) -> (i32, i32) {
    %c0_i32 = arith.constant 0 : i32
    %c0_i32_0 = arith.constant 0 : i32
    return %arg0, %c0_i32 : i32, i32
  }
  func.func @transform_1(%arg0: i32) -> (i32, i32) {
    %c0_i32 = arith.constant 0 : i32
    %c0_i32_0 = arith.constant 0 : i32
    return %arg0, %c0_i32 : i32, i32
  }
  func.func @transform_2(%arg0: i32) -> (i32, i32) {
    %c0_i32 = arith.constant 0 : i32
    %c0_i32_0 = arith.constant 0 : i32
    return %arg0, %c0_i32 : i32, i32
  }
}

</mosaic_0001>

<bundles_post_ra>
// kernel: tpu_custom_call.1
= control target key start
LH: loop header
LB: loop body
LE: loop exit
PB: predicated region body
PF: predicated region fallthrough
CT: control target
= control target key end

     0   :  { %7 = vsyncpa [#allocation3], 0  ;;  %s424_s0 = inlined_call_operand.hbm [shape: f32[32,128], index: 0, kind: input, shape index: {}]   ;;  %s425_s1 = inlined_call_operand.hbm [shape: f32[32,128], index: 1, kind: input, shape index: {}]   ;;  %s426_s2 = inlined_call_operand.hbm [shape: f32[32,128], index: 2, kind: output, shape index: {}]  }
   0x1   :  { %8 = vsyncpa [#allocation6], 0 }
   0x2   :  { %9 = vsyncpa [#allocation4], 0  ;;  %s14_s11 = sshll.u32 %s424_s0, 4  ;;  %s284_s12 = smov [#allocation2]   ;;  %s15_s11 = int_to_ptr.hbm [resolvable:$true] %s14_s11 }
   0x3   :  { %s16_s13 = sshll.u32 %s284_s12, 4  ;;  %s27_s16 = sshll.u32 %s425_s1, 4  ;;  %s17_s13 = int_to_ptr.vmem [resolvable:$true] %s16_s13  ;;  %s28_s16 = int_to_ptr.hbm [resolvable:$true] %s27_s16 }
   0x4   :  { %s285_s17 = smov 128   ;;  %s286_s18 = smov 8  }
   0x5   :  { %22 = dma.hbm_to_vmem [thread:$0]  %s15_s11, 512, %s17_s13, [#allocation3], %s285_s17, %s285_s17, %s286_s18  }
   0x6   :  { %s287_s19 = smov [#allocation5]  }
   0x7   :  { %s29_s20 = sshll.u32 %s287_s19, 4  ;;  %s30_s20 = int_to_ptr.vmem [resolvable:$true] %s29_s20 }
   0x8   :  { %35 = dma.hbm_to_vmem [thread:$0]  %s28_s16, 512, %s30_s20, [#allocation6], %s285_s17, %s285_s17, %s286_s18  }
   0x9   :  { %278 = dma.done.wait [#allocation3], 512  }
   0xa   :  { %279 = vsyncadd [#allocation3], 4294966784 }
   0xb   :  { %280 = dma.done.wait [#allocation6], 512  }
   0xc   :  { %281 = vsyncadd [#allocation6], 4294966784  ;;  %v52_v0 = vlaneseq  ;;  %s288_s0 = smov 2   ;;  %v289_v4 = vmov 0.2   ;;  %v49_v6 = vld [vmem:[#allocation5 + $0x8] sm:$0xff] }
   0xd   :  { %v48_v7 = vld [vmem:[#allocation5] sm:$0xff]  ;;  %v51_v8 = vld [vmem:[#allocation5 + $0x18] sm:$0xff]  ;;  %v50_v13 = vld [vmem:[#allocation5 + $0x10] sm:$0xff]  ;;  %s290_s1 = smov 126   ;;  %v291_v24 = vmov 0   ;;  %v292_v46 = vmov 0.5  }
   0xe   :  { %v53_v1 = vand.u32 127, %v52_v0  ;;  %v346_v15 = vld [vmem:[#allocation2] sm:$0xff]  ;;  %v45_v16 = vld [vmem:[#allocation2 + $0x8] sm:$0xff]  ;;  %v351_v17 = vld [vmem:[#allocation2 + $0x10] sm:$0xff]  ;;  %v293_v51 = vmov 1.0   ;;  %s294_s21 = smov [#allocation7]  }
   0xf   :  { %v354_v18 = vld [vmem:[#allocation2 + $0x18] sm:$0xff]  ;;  %s171_s22 = sshll.u32 %s294_s21, 4  ;;  %s173_s25 = sshll.u32 %s426_s2, 4  ;;  %s172_s22 = int_to_ptr.vmem [resolvable:$true] %s171_s22  ;;  %s174_s25 = int_to_ptr.hbm [resolvable:$true] %s173_s25 }
  0x10   :  { %v56_v2 = vshra.s32 %v53_v1, 2  ;;  %v322_v3 = vand.u32 3, %v53_v1 }
  0x12   :  { %57 = vrot.lane.b32.xlu0 %v56_v2, %s288_s0  ;;  %vm60_vm0 = vcmp.eq.s32.totalorder %v322_v3, 0  ;;  %vm61_vm1 = vcmp.eq.s32.totalorder %v322_v3, 1  ;;  %vm55_vm4 = vcmp.lt.s32.totalorder %v322_v3, 2 }
  0x13   :  { %v62_v5 = vsel %vm61_vm1, 0.1, %v289_v4  ;;  %v70_v47 = vsel %vm55_vm4, -0.5, %v292_v46  ;;  %v69_v52 = vsel %vm55_vm4, -1.0, %v293_v51 }
  0x14   :  { %v63_v9 = vsel %vm60_vm0, 0.1, %v62_v5 }
  0x15   :  { %v327_v10 = vmul.f32 %v63_v9, %v49_v6  ;;  %v329_v11 = vmul.f32 %v63_v9, %v51_v8  ;;  %v331_v12 = vmul.f32 %v63_v9, %v48_v7  ;;  %v339_v14 = vmul.f32 %v63_v9, %v50_v13 }
  0x17   :  { %97 = vrot.lane.b32.xlu1 %v327_v10, %s288_s0  ;;  %101 = vrot.lane.b32.xlu2 %v329_v11, %s288_s0 }
  0x1a   :  { %95 = vrot.lane.b32.xlu0 %v331_v12, %s288_s0 }
  0x1f   :  { %99 = vrot.lane.b32.xlu1 %v339_v14, %s288_s0  ;;  %103 = vrot.lane.b32.xlu2 %v331_v12, %s290_s1 }
  0x22   :  { %105 = vrot.lane.b32.xlu0 %v327_v10, %s290_s1 }
  0x27   :  { %107 = vrot.lane.b32.xlu1 %v339_v14, %s290_s1  ;;  %109 = vrot.lane.b32.xlu2 %v329_v11, %s290_s1 }
  0x2a   :  { %75 = vrot.lane.b32.xlu0 %v346_v15, %s288_s0 }
  0x2f   :  { %77 = vrot.lane.b32.xlu1 %v45_v16, %s288_s0  ;;  %79 = vrot.lane.b32.xlu2 %v351_v17, %s288_s0 }
  0x32   :  { %81 = vrot.lane.b32.xlu0 %v354_v18, %s288_s0 }
  0x37   :  { %83 = vrot.lane.b32.xlu1 %v346_v15, %s290_s1  ;;  %85 = vrot.lane.b32.xlu2 %v45_v16, %s290_s1 }
  0x3a   :  { %87 = vrot.lane.b32.xlu0 %v351_v17, %s290_s1 }
  0x3f   :  { %89 = vrot.lane.b32.xlu1 %v354_v18, %s290_s1 }
  0x71   :  { %v102_v19 = vpop.permute.xlu2 %101 }
  0x79   :  { %v104_v20 = vpop.permute.xlu2 %103 }
  0x81   :  { %v110_v26 = vpop.permute.xlu2 %109 }
  0x84   :  { %v58_v21 = vpop.permute.xlu0 %57 }
  0x85   :  { %vm59_vm2 = vcmp.eq.s32.totalorder %v58_v21, %v56_v2 }
  0x86   :  { %v66_v25 = vsel %vm59_vm2, 1, %v291_v24 }
  0x87   :  { %v67_v27 = vperm.slane %v66_v25, 0 }
  0x89   :  { %v98_v22 = vpop.permute.xlu1 %97  ;;  %vm363_vm3 = vcmp.eq.s32.totalorder %v67_v27, 1  ;;  %v80_v32 = vpop.permute.xlu2 %79 }
  0x8a   :  { %v114_v42 = vsel %vm363_vm3, %v102_v19, %v110_v26 }
  0x8b   :  { %v138_v48 = vsel %vm55_vm4, %v114_v42, %v329_v11 }
  0x8c   :  { %v96_v23 = vpop.permute.xlu0 %95  ;;  %v145_v56 = vmul.f32 1.442695, %v138_v48 }
  0x8d   :  { %v111_v33 = vsel %vm363_vm3, %v96_v23, %v104_v20 }
  0x8e   :  { %v135_v36 = vsel %vm55_vm4, %v111_v33, %v331_v12  ;;  %v131_v8 = vsel %vm55_vm4, %v331_v12, %v111_v33 }
  0x8f   :  { %v139_v39 = vmul.f32 1.442695, %v135_v36 }
  0x91   :  { %v100_v28 = vpop.permute.xlu1 %99  ;;  %v86_v45 = vpop.permute.xlu2 %85 }
  0x94   :  { %v106_v30 = vpop.permute.xlu0 %105 }
  0x95   :  { %v112_v31 = vsel %vm363_vm3, %v98_v22, %v106_v30 }
  0x96   :  { %v136_v34 = vsel %vm55_vm4, %v112_v31, %v327_v10  ;;  %v132_v57 = vsel %vm55_vm4, %v327_v10, %v112_v31 }
  0x97   :  { %v141_v35 = vmul.f32 1.442695, %v136_v34 }
  0x99   :  { %198 = vpow2.f32 %v141_v35  ;;  %v108_v37 = vpop.permute.xlu1 %107 }
  0x9a   :  { %v113_v38 = vsel %vm363_vm3, %v100_v28, %v108_v37  ;;  %200 = vpow2.f32 %v139_v39 }
  0x9b   :  { %v137_v40 = vsel %vm55_vm4, %v113_v38, %v339_v14 }
  0x9c   :  { %v76_v41 = vpop.permute.xlu0 %75  ;;  %v143_v44 = vmul.f32 1.442695, %v137_v40 }
  0x9e   :  { %202 = vpow2.f32 %v143_v44 }
  0x9f   :  { %v199_v43 = vpop.eup %198  ;;  %204 = vpow2.f32 %v145_v56 }
  0xa0   :  { %v148_v49 = vmul.f32 %v199_v43, %v70_v47  ;;  %v201_v61 = vpop.eup %200 }
  0xa1   :  { %v78_v50 = vpop.permute.xlu1 %77  ;;  %v147_v1 = vmul.f32 %v201_v61, %v70_v47 }
  0xa2   :  { %v92_v53 = vsel %vm363_vm3, %v78_v50, %v86_v45  ;;  %v152_v59 = vadd.f32 %v148_v49, %v132_v57 }
  0xa3   :  { %v116_v54 = vsub.f32 %v45_v16, %v92_v53  ;;  %v124_v55 = vadd.f32 %v92_v53, %v45_v16  ;;  %v151_v13 = vadd.f32 %v147_v1, %v131_v8 }
  0xa4   :  { %v82_v58 = vpop.permute.xlu0 %81  ;;  %v203_v0 = vpop.eup %202 }
  0xa5   :  { %v120_v60 = vmul.f32 %v116_v54, %v69_v52  ;;  %v128_v62 = vmul.f32 0.5, %v124_v55  ;;  %v149_v9 = vmul.f32 %v203_v0, %v70_v47  ;;  %v205_v20 = vpop.eup %204 }
  0xa6   :  { %v150_v26 = vmul.f32 %v205_v20, %v70_v47 }
  0xa7   :  { %v156_v63 = vmul.f32 %v152_v59, %v120_v60 }
  0xa9   :  { %v160_v2 = vadd.f32 %v156_v63, %v128_v62  ;;  %v84_v4 = vpop.permute.xlu1 %83 }
  0xaa   :  { %v91_v5 = vsel %vm363_vm3, %v76_v41, %v84_v4 }
  0xab   :  { %164 = vst [vmem:[#allocation7 + $0x8] sm:$0xff] %v160_v2  ;;  %v115_v6 = vsub.f32 %v346_v15, %v91_v5  ;;  %v123_v7 = vadd.f32 %v91_v5, %v346_v15  ;;  %v133_v15 = vsel %vm55_vm4, %v339_v14, %v113_v38  ;;  %v134_v14 = vsel %vm55_vm4, %v329_v11, %v114_v42 }
  0xac   :  { %v88_v10 = vpop.permute.xlu0 %87  ;;  %v153_v25 = vadd.f32 %v149_v9, %v133_v15  ;;  %v154_v35 = vadd.f32 %v150_v26, %v134_v14 }
  0xad   :  { %v119_v16 = vmul.f32 %v115_v6, %v69_v52  ;;  %v93_v19 = vsel %vm363_vm3, %v80_v32, %v88_v10  ;;  %v127_v23 = vmul.f32 0.5, %v123_v7 }
  0xae   :  { %v117_v21 = vsub.f32 %v351_v17, %v93_v19  ;;  %v125_v22 = vadd.f32 %v93_v19, %v351_v17 }
  0xaf   :  { %v155_v24 = vmul.f32 %v151_v13, %v119_v16 }
  0xb0   :  { %v121_v12 = vmul.f32 %v117_v21, %v69_v52  ;;  %v129_v30 = vmul.f32 0.5, %v125_v22 }
  0xb1   :  { %v159_v27 = vadd.f32 %v155_v24, %v127_v23  ;;  %v90_v28 = vpop.permute.xlu1 %89 }
  0xb2   :  { %v157_v31 = vmul.f32 %v153_v25, %v121_v12  ;;  %v94_v32 = vsel %vm363_vm3, %v82_v58, %v90_v28 }
  0xb3   :  { %163 = vst [vmem:[#allocation7] sm:$0xff] %v159_v27  ;;  %v118_v33 = vsub.f32 %v354_v18, %v94_v32  ;;  %v126_v17 = vadd.f32 %v94_v32, %v354_v18 }
  0xb4   :  { %v161_v34 = vadd.f32 %v157_v31, %v129_v30 }
  0xb5   :  { %v122_v36 = vmul.f32 %v118_v33, %v69_v52  ;;  %v130_v29 = vmul.f32 0.5, %v126_v17 }
  0xb6   :  { %165 = vst [vmem:[#allocation7 + $0x10] sm:$0xff] %v161_v34 }
  0xb7   :  { %v158_v37 = vmul.f32 %v154_v35, %v122_v36 }
  0xb9   :  { %v162_v38 = vadd.f32 %v158_v37, %v130_v29 }
  0xbb   :  { %166 = vst [vmem:[#allocation7 + $0x18] sm:$0xff] %v162_v38 }
  0xbc   :  { %179 = dma.vmem_to_hbm [thread:$0]  %s172_s22, 512, %s174_s25, [#allocation4], %s285_s17, %s285_s17, %s286_s18  }
  0xbd   :  { %282 = dma.done.wait [#allocation4], 512  }
  0xbe   :  { %283 = vsyncadd [#allocation4], 4294966784 }
  0xbf   :  { %184 = vsyncpa [#allocation3], 1 }
  0xc0   :  { %185 = vsyncpa [#allocation6], 1 }
  0xc1   :  { %186 = vsyncpa [#allocation4], 1 }

</bundles_post_ra>
